<compile_context>
chip_gen: v5e
topology: v5e:2x2
jax: 0.10.0
libtpu: 0.0.40
codegen_flags: <defaults>
</compile_context>

<pallas_src>
import functools

import jax
import jax.numpy as jnp
from jax.experimental import pallas as pl
from jax.experimental.pallas import tpu as pltpu

# Fixed depthwise stencils from uSNCA.__init__ (PyTorch Conv2d = cross-corr.).
# Separable forms used by the kernel:
#   K1 = [1,2,1]^T (x) [1,2,1] - 16*delta      (Laplacian-ish)
#   K2 = [1,2,1]^T (x) [-1,0,1]                (Sobel-x)
#   K3 = [-1,0,1]^T (x) [1,2,1]                (Sobel-y)
_K1 = ((1.0, 2.0, 1.0), (2.0, -12.0, 2.0), (1.0, 2.0, 1.0))
_K2 = ((-1.0, 0.0, 1.0), (-2.0, 0.0, 2.0), (-1.0, 0.0, 1.0))
_K3 = ((-1.0, -2.0, -1.0), (0.0, 0.0, 0.0), (1.0, 2.0, 1.0))


def _usnca_kernel(x_ref, idx_ref, w_ref, b_ref, o_ref, *, height, width):
    """One grid step: a block of whole images, lane-flattened.

    x_ref / o_ref : (C, N) f32, N = batch_block * H * W   (lane-dense)
    idx_ref       : (2, N) int32 -- row 0: column j, row 1: row i (per image)
    w_ref         : (C, 8C) f32  -- 1x1-conv weight, PyTorch channel order
    b_ref         : (C, 1)  f32  -- 1x1-conv bias
    """
    C, N = x_ref.shape
    H, W = height, width

    x = x_ref[...]
    idx = idx_ref[...]
    col = idx[0:1, :]
    row = idx[1:2, :]

    def shifted(v, shift, wrap_shift, wrap_mask):
        # Circular neighbor on the flat lane axis: plain roll by `shift`;
        # lanes sitting on a row/image boundary are fixed up with a roll by
        # `wrap_shift` (pulls the value from the other end of the SAME row /
        # image).  Shifts are static, so rolls land in the (otherwise idle)
        # XLU rotate slot.
        base = pltpu.roll(v, shift % N, axis=1)
        if wrap_shift % N == shift % N:        # one image per block: no fixup
            return base
        return jnp.where(wrap_mask, pltpu.roll(v, wrap_shift % N, axis=1), base)

    # --- horizontal (W-direction) circular neighbors -------------------------
    xl = shifted(x, 1, -(W - 1), col == 0)             # x[i, j-1]
    xr = shifted(x, -1, W - 1, col == (W - 1))         # x[i, j+1]
    row_s = xl + 2.0 * x + xr                          # horizontal [1, 2, 1]
    row_d = xr - xl                                    # horizontal [-1, 0, 1]

    # --- vertical (H-direction) circular neighbors ---------------------------
    first_row = row == 0
    last_row = row == (H - 1)
    su = shifted(row_s, W, -(H - 1) * W, first_row)    # row_s[i-1, j]
    sd = shifted(row_s, -W, (H - 1) * W, last_row)     # row_s[i+1, j]
    du = shifted(row_d, W, -(H - 1) * W, first_row)
    dd = shifted(row_d, -W, (H - 1) * W, last_row)

    s1 = (su + 2.0 * row_s + sd) - 16.0 * x            # K1
    s2 = du + 2.0 * row_d + dd                         # K2
    s3 = sd - su                                       # K3

    # --- fused 1x1 conv (8C -> C) on the MXU + bias + residual ---------------
    p = jnp.concatenate([x, s1, s2, s3], axis=0)       # (4C, N)
    y = jnp.concatenate([p, jnp.abs(p)], axis=0)       # (8C, N)
    acc = x + b_ref[...] + jnp.dot(w_ref[...], y,
                                   preferred_element_type=jnp.float32)
    o_ref[...] = acc.astype(o_ref.dtype)


def _pick_batch_block(B, C, HW, itemsize=4):
    """Images per grid step: large blocks amortize the ~0.35 us step cost and
    widen the MXU RHS, but keep >= 2 steps when B >= 2 (v7x dual-TC) and stay
    well inside a conservative VMEM budget (v7x has only 64 MiB)."""
    per_image = 28 * C * HW * itemsize   # ~live stencil planes + y + I/O buffers
    budget = 24 << 20
    bb = max(1, min(B, budget // per_image))
    if B >= 2:
        bb = min(bb, max(1, B // 2))     # keep a parallel axis for v7x's 2nd core
    while B % bb:                        # block must tile the batch evenly
        bb -= 1
    return bb


@functools.partial(jax.jit, static_argnames=("batch_block",))
def usnca_forward(x, w2, bias, *, batch_block=None):
    """x: (B, C, H, W) f32; w2: (C, 8C) f32 (1x1-conv weight); bias: (C,) f32."""
    B, C, H, W = x.shape
    assert w2.shape == (C, 8 * C) and bias.shape == (C,)
    assert H >= 2 and W >= 2
    HW = H * W
    # TODO(synk): pad H*W up to a multiple of 128 (and mask the tail) to support
    # non-lane-aligned NCA grids (e.g. 9x9); 16x16 / 32x32 / 64x64 are aligned.
    assert HW % 128 == 0, "H*W must be a multiple of 128 for the lane-dense layout"

    bb = batch_block or _pick_batch_block(B, C, HW, jnp.dtype(x.dtype).itemsize)
    assert B % bb == 0
    num_blocks = B // bb
    lanes = bb * HW

    # Lane-dense layout (C, B*H*W); each grid step takes `bb` whole images.
    x_flat = jnp.transpose(x, (1, 0, 2, 3)).reshape(C, B * HW)
    b2d = bias.reshape(C, 1)

    # Per-lane (column j, row i) indices; identical for every block since each
    # block holds whole images.
    lin = jnp.arange(lanes, dtype=jnp.int32) % HW
    idx = jnp.stack([lin % W, lin // W], axis=0)        # (2, lanes) int32

    kernel = functools.partial(_usnca_kernel, height=H, width=W)
    out_flat = pl.pallas_call(
        kernel,
        out_shape=jax.ShapeDtypeStruct((C, B * HW), x.dtype),
        grid=(num_blocks,),
        in_specs=[
            pl.BlockSpec((C, lanes), lambda g: (0, g)),      # x block
            pl.BlockSpec((2, lanes), lambda g: (0, 0)),      # col/row indices
            pl.BlockSpec((C, 8 * C), lambda g: (0, 0)),      # 1x1-conv weight
            pl.BlockSpec((C, 1), lambda g: (0, 0)),          # bias
        ],
        out_specs=pl.BlockSpec((C, lanes), lambda g: (0, g)),
        compiler_params=pltpu.CompilerParams(
            dimension_semantics=("parallel",)),
    )(x_flat, idx, w2, b2d)
    return jnp.transpose(out_flat.reshape(C, B, H, W), (1, 0, 2, 3))


# ------------------------- pure-JAX reference (for checking) -------------------
_K1j = jnp.array(_K1, jnp.float32)
_K2j = jnp.array(_K2, jnp.float32)
_K3j = jnp.array(_K3, jnp.float32)


def _dw_circular_ref(x, k):
    B, C, H, W = x.shape
    xp = jnp.pad(x, ((0, 0), (0, 0), (1, 1), (1, 1)), mode="wrap")
    w = jnp.broadcast_to(k[None, None, :, :], (C, 1, 3, 3))
    return jax.lax.conv_general_dilated(
        xp, w, window_strides=(1, 1), padding="VALID",
        dimension_numbers=("NCHW", "OIHW", "NCHW"),
        feature_group_count=C)


def usnca_ref(x, w2, bias):
    s1 = _dw_circular_ref(x, _K1j)
    s2 = _dw_circular_ref(x, _K2j)
    s3 = _dw_circular_ref(x, _K3j)
    p = jnp.concatenate([x, s1, s2, s3], axis=1)
    y = jnp.concatenate([p, jnp.abs(p)], axis=1)
    out = jnp.einsum("bkhw,ok->bohw", y, w2) + bias[None, :, None, None]
    return x + out


if __name__ == "__main__":
    key = jax.random.PRNGKey(0)
    # B=2 exercises the one-image-per-block path (grid=(2,)); B=4 exercises the
    # batch-folded path (2 images per block, cross-image row-wrap fixup).
    for B in (2, 4):
        C, H, W = 4, 16, 16          # out_features = 4
        k_x, k_w, k_b = jax.random.split(jax.random.fold_in(key, B), 3)

        x = jax.random.normal(k_x, (B, C, H, W), jnp.float32)

        # Deterministic init of conv2 (1x1, 8C -> C, with bias), PyTorch-style bound.
        fan_in = 8 * C
        bound = 1.0 / (fan_in ** 0.5)
        w2 = jax.random.uniform(k_w, (C, 8 * C), jnp.float32, -bound, bound)
        bias = jax.random.uniform(k_b, (C,), jnp.float32, -bound, bound)

        out = jax.block_until_ready(usnca_forward(x, w2, bias))
        ref = usnca_ref(x, w2, bias)
        assert out.shape == (B, C, H, W)
        max_err = float(jnp.max(jnp.abs(out - ref)))
        assert max_err < 1e-3, f"B={B}: mismatch vs reference, max abs err = {max_err}"

    # TODO(synk): torch.nn.utils.clip_grad_norm_ in __call__ is a training-time
    # gradient op (no effect on forward semantics) and is not translated.
    print("KERNEL_OK")
</pallas_src>

<mosaic_0001>
module attributes {stable_mosaic.version = 11 : i64} {
  func.func @_usnca_kernel(%arg0: i32, %arg1: memref<4x256xf32, #tpu.memory_space<vmem>>, %arg2: memref<2x256xi32, #tpu.memory_space<vmem>>, %arg3: memref<4x32xf32, #tpu.memory_space<vmem>>, %arg4: memref<4x1xf32, #tpu.memory_space<vmem>>, %arg5: memref<4x256xf32, #tpu.memory_space<vmem>>) attributes {dimension_semantics = [#tpu.dimension_semantics<parallel>], iteration_bounds = array<i64: 2>, scalar_prefetch = 0 : i64, scratch_operands = 0 : i64, tpu.core_type = #tpu.core_type<tc>, window_params = [{transform_indices = @transform_0, window_bounds = array<i64: 4, 256>}, {pipeline_mode = #tpu.pipeline_mode<synchronous>, transform_indices = @transform_1, window_bounds = array<i64: 2, 256>}, {pipeline_mode = #tpu.pipeline_mode<synchronous>, transform_indices = @transform_2, window_bounds = array<i64: 4, 32>}, {pipeline_mode = #tpu.pipeline_mode<synchronous>, transform_indices = @transform_3, window_bounds = array<i64: 4, 1>}, {transform_indices = @transform_4, window_bounds = array<i64: 4, 256>}]} {
    %c0 = arith.constant 0 : index
    %c0_0 = arith.constant 0 : index
    %0 = vector.load %arg1[%c0, %c0_0] : memref<4x256xf32, #tpu.memory_space<vmem>>, vector<4x256xf32>
    %c0_1 = arith.constant 0 : index
    %c0_2 = arith.constant 0 : index
    %1 = vector.load %arg2[%c0_1, %c0_2] : memref<2x256xi32, #tpu.memory_space<vmem>>, vector<2x256xi32>
    %2 = vector.extract_strided_slice %1 {offsets = [0, 0], sizes = [1, 256], strides = [1, 1]} : vector<2x256xi32> to vector<1x256xi32>
    %c0_i32 = arith.constant 0 : i32
    %3 = vector.broadcast %c0_i32 : i32 to vector<1x256xi32>
    %4 = arith.cmpi eq, %2, %3 : vector<1x256xi32>
    %c1_i32 = arith.constant 1 : i32
    %5 = tpu.dynamic_rotate %0 by %c1_i32 dim 1 : vector<4x256xf32>, i32 -> vector<4x256xf32>
    %c241_i32 = arith.constant 241 : i32
    %6 = tpu.dynamic_rotate %0 by %c241_i32 dim 1 : vector<4x256xf32>, i32 -> vector<4x256xf32>
    %7 = vector.shape_cast %4 : vector<1x256xi1> to vector<1x256xi1>
    %8 = vector.broadcast %7 : vector<1x256xi1> to vector<4x256xi1>
    %9 = arith.select %8, %6, %5 : vector<4x256xi1>, vector<4x256xf32>
    %c15_i32 = arith.constant 15 : i32
    %10 = vector.broadcast %c15_i32 : i32 to vector<1x256xi32>
    %11 = arith.cmpi eq, %2, %10 : vector<1x256xi32>
    %c255_i32 = arith.constant 255 : i32
    %12 = tpu.dynamic_rotate %0 by %c255_i32 dim 1 : vector<4x256xf32>, i32 -> vector<4x256xf32>
    %c15_i32_3 = arith.constant 15 : i32
    %13 = tpu.dynamic_rotate %0 by %c15_i32_3 dim 1 : vector<4x256xf32>, i32 -> vector<4x256xf32>
    %14 = vector.shape_cast %11 : vector<1x256xi1> to vector<1x256xi1>
    %15 = vector.broadcast %14 : vector<1x256xi1> to vector<4x256xi1>
    %16 = arith.select %15, %13, %12 : vector<4x256xi1>, vector<4x256xf32>
    %cst = arith.constant 2.000000e+00 : f32
    %17 = vector.broadcast %cst : f32 to vector<4x256xf32>
    %18 = arith.mulf %17, %0 : vector<4x256xf32>
    %19 = arith.addf %9, %18 : vector<4x256xf32>
    %20 = arith.addf %19, %16 : vector<4x256xf32>
    %21 = arith.subf %16, %9 : vector<4x256xf32>
    %c16_i32 = arith.constant 16 : i32
    %22 = tpu.dynamic_rotate %20 by %c16_i32 dim 1 : vector<4x256xf32>, i32 -> vector<4x256xf32>
    %c240_i32 = arith.constant 240 : i32
    %23 = tpu.dynamic_rotate %20 by %c240_i32 dim 1 : vector<4x256xf32>, i32 -> vector<4x256xf32>
    %c16_i32_4 = arith.constant 16 : i32
    %24 = tpu.dynamic_rotate %21 by %c16_i32_4 dim 1 : vector<4x256xf32>, i32 -> vector<4x256xf32>
    %c240_i32_5 = arith.constant 240 : i32
    %25 = tpu.dynamic_rotate %21 by %c240_i32_5 dim 1 : vector<4x256xf32>, i32 -> vector<4x256xf32>
    %cst_6 = arith.constant 2.000000e+00 : f32
    %26 = vector.broadcast %cst_6 : f32 to vector<4x256xf32>
    %27 = arith.mulf %26, %20 : vector<4x256xf32>
    %28 = arith.addf %22, %27 : vector<4x256xf32>
    %29 = arith.addf %28, %23 : vector<4x256xf32>
    %cst_7 = arith.constant 1.600000e+01 : f32
    %30 = vector.broadcast %cst_7 : f32 to vector<4x256xf32>
    %31 = arith.mulf %30, %0 : vector<4x256xf32>
    %32 = arith.subf %29, %31 : vector<4x256xf32>
    %cst_8 = arith.constant 2.000000e+00 : f32
    %33 = vector.broadcast %cst_8 : f32 to vector<4x256xf32>
    %34 = arith.mulf %33, %21 : vector<4x256xf32>
    %35 = arith.addf %24, %34 : vector<4x256xf32>
    %36 = arith.addf %35, %25 : vector<4x256xf32>
    %37 = arith.subf %23, %22 : vector<4x256xf32>
    %38 = tpu.concatenate %0, %32, %36, %37 in 0 : vector<4x256xf32>, vector<4x256xf32>, vector<4x256xf32>, vector<4x256xf32> -> vector<16x256xf32>
    %39 = math.absf %38 : vector<16x256xf32>
    %40 = tpu.concatenate %38, %39 in 0 : vector<16x256xf32>, vector<16x256xf32> -> vector<32x256xf32>
    %c0_9 = arith.constant 0 : index
    %c0_10 = arith.constant 0 : index
    %41 = vector.load %arg4[%c0_9, %c0_10] : memref<4x1xf32, #tpu.memory_space<vmem>>, vector<4x1xf32>
    %42 = vector.broadcast %41 : vector<4x1xf32> to vector<4x256xf32>
    %43 = arith.addf %0, %42 : vector<4x256xf32>
    %c0_11 = arith.constant 0 : index
    %c0_12 = arith.constant 0 : index
    %44 = vector.load %arg3[%c0_11, %c0_12] : memref<4x32xf32, #tpu.memory_space<vmem>>, vector<4x32xf32>
    %cst_13 = arith.constant dense<0.000000e+00> : vector<4x256xf32>
    %45 = tpu.matmul %44, %40, %cst_13 {dimension_numbers = #tpu.dot_dimension_numbers<[1], [0], [0], [1], [0, 0, 1, 1], [], []>} : vector<4x32xf32>, vector<32x256xf32>, vector<4x256xf32> -> vector<4x256xf32>
    %46 = arith.addf %43, %45 : vector<4x256xf32>
    %c0_14 = arith.constant 0 : index
    %c0_15 = arith.constant 0 : index
    %47 = vector.load %arg5[%c0_14, %c0_15] : memref<4x256xf32, #tpu.memory_space<vmem>>, vector<4x256xf32>
    tpu.vector_store %arg5[%c0_14, %c0_15], %46 {strides = array<i32>} : memref<4x256xf32, #tpu.memory_space<vmem>>, vector<4x256xf32>,
    return
  }
  func.func @transform_0(%arg0: i32) -> (i32, i32) {
    %c0_i32 = arith.constant 0 : i32
    %c0_i32_0 = arith.constant 0 : i32
    return %c0_i32, %arg0 : i32, i32
  }
  func.func @transform_1(%arg0: i32) -> (i32, i32) {
    %c0_i32 = arith.constant 0 : i32
    %c0_i32_0 = arith.constant 0 : i32
    %c0_i32_1 = arith.constant 0 : i32
    return %c0_i32, %c0_i32_0 : i32, i32
  }
  func.func @transform_2(%arg0: i32) -> (i32, i32) {
    %c0_i32 = arith.constant 0 : i32
    %c0_i32_0 = arith.constant 0 : i32
    %c0_i32_1 = arith.constant 0 : i32
    return %c0_i32, %c0_i32_0 : i32, i32
  }
  func.func @transform_3(%arg0: i32) -> (i32, i32) {
    %c0_i32 = arith.constant 0 : i32
    %c0_i32_0 = arith.constant 0 : i32
    %c0_i32_1 = arith.constant 0 : i32
    return %c0_i32, %c0_i32_0 : i32, i32
  }
  func.func @transform_4(%arg0: i32) -> (i32, i32) {
    %c0_i32 = arith.constant 0 : i32
    %c0_i32_0 = arith.constant 0 : i32
    return %c0_i32, %arg0 : i32, i32
  }
}

</mosaic_0001>

<bundles_post_ra>
// kernel: usnca_forward.1
= control target key start
LH: loop header
LB: loop body
LE: loop exit
PB: predicated region body
PF: predicated region fallthrough
CT: control target
= control target key end

     0   :  { %s553_s15 = smov 0   ;;  %s625_s0 = inlined_call_operand.vmem [shape: f32[4,512], index: 0, kind: input, shape index: {}]   ;;  %s626_s1 = inlined_call_operand.vmem [shape: s32[2,256], index: 1, kind: input, shape index: {}]   ;;  %s627_s2 = inlined_call_operand.vmem [shape: f32[4,32], index: 2, kind: input, shape index: {}]   ;;  %s628_s3 = inlined_call_operand.vmem [shape: f32[4,1], index: 3, kind: input, shape index: {}]   ;;  %s629_s4 = inlined_call_operand.vmem [shape: f32[4,512], index: 4, kind: output, shape index: {}]  }
   0x1 LB: > { %s481_s16 = sadd.s32 4294967295, %s518_s15   ;;  %p485_p0 = scmp.ge.s32.totalorder %s518_s15, 1  ;;  %s518_s15 = sphi %s553_s15, %s14_s15  }
   0x2   : > { %p163_p1 = scmp.lt.s32.totalorder %s518_s15, 3 }
   0x4   : > { %p164_p2 = pnand %p485_p0, %p163_p1 }
   0x5   : > { %s486_s17 = sshll.u32 (!%p164_p2), %s481_s16, 1  ;;  %s520_s22 = smov (!%p164_p2), 1  }
   0x6   : > { %167 = sbr.rel (%p164_p2) target bundleno = 442 (0x1ba), region = 36  ;;  %p190_p3 = scmp.lt.s32.totalorder (!%p164_p2), %s486_s17, 3 }
   0x7   : > { %s521_s23 = smov (!%p164_p2), 113   ;;  %s522_s24 = smov (!%p164_p2), 127  }
   0x8   : > { %s523_s25 = smov (!%p164_p2), 15   ;;  %s525_s28 = smov (!%p164_p2), 16  }
   0x9   : > { %s526_s29 = smov (!%p164_p2), 112  }
   0xb   : > { %s631_s17 = smov (!%p190_p3, %s486_s17), 3  ;;  %v524_v10 = vmov 0   ;;  %v202_v14 = vld [vmem:[%s626_s1] sm:$0xf]  ;;  %v214_v18 = vlaneseq  ;;  %vm353_vm12 = vcmask 1043456   ;;  %vm374_vm13 = vcmask 261120  }
   0xc   : > { %s487_s18 = sshll.u32 %s631_s17, 2  ;;  %510 = vset.pattern.permute.xlu1 %v524_v10  ;;  %511 = vset.pattern.permute.xlu0 %v524_v10  ;;  %vm203_vm0 = vcmp.eq.s32.totalorder %v202_v14, 0  ;;  %vm240_vm1 = vcmp.eq.s32.totalorder %v202_v14, 15  ;;  %v362_v56 = vld [vmem:[%s628_s3] sm:$0xf] }
   0xd   : > { %s193_s21 = scalar_lea.vmem %s625_s0, %s487_s18  ;;  %v231_v16 = vsel %vm203_vm0, 1, %v524_v10  ;;  %v265_v22 = vsel %vm240_vm1, 1, %v524_v10  ;;  %v580_v23 = vand.u32 127, %v214_v18  ;;  %s199_s10 = scalar_lea.vmem %s629_s4, %s487_s18 }
   0xe   : > { %v569_v0 = vld [vmem:[%s193_s21] sm:$0xff]  ;;  %v232_v19 = vperm.slane %v231_v16, 0  ;;  %v233_v20 = vperm.slane %v231_v16, 2  ;;  %v266_v26 = vperm.slane %v265_v22, 0  ;;  %v267_v27 = vperm.slane %v265_v22, 2 }
   0xf   : > { %205 = vst [vmem:[#allocation1] ss:$2 sm:$0xff] %v569_v0  ;;  %v274_v7 = vmul.f32 2.0, %v569_v0  ;;  %v319_v11 = vmul.f32 16.0, %v569_v0  ;;  %vm228_vm2 = vcmp.lt.s32.totalorder %v580_v23, 113  ;;  %vm216_vm3 = vcmp.lt.s32.totalorder %v580_v23, 1 }
  0x10   : > { %v234_v24 = vperm.slane %v232_v19, 0  ;;  %v235_v25 = vperm.slane %v233_v20, 0  ;;  %v268_v32 = vperm.slane %v266_v26, 0  ;;  %v269_v33 = vperm.slane %v267_v27, 0 }
  0x11   : > { %vm250_vm6 = vcmp.lt.s32.totalorder %v580_v23, 127  ;;  %vm262_vm7 = vcmp.lt.s32.totalorder %v580_v23, 15  ;;  %vm291_vm10 = vcmp.lt.s32.totalorder %v580_v23, 16  ;;  %vm298_vm11 = vcmp.lt.s32.totalorder %v580_v23, 112 }
  0x12   : > { %vm236_vm4 = vcmp.eq.s32.totalorder %v234_v24, 1  ;;  %vm237_vm5 = vcmp.eq.s32.totalorder %v235_v25, 1  ;;  %vm270_vm8 = vcmp.eq.s32.totalorder %v268_v32, 1  ;;  %vm271_vm9 = vcmp.eq.s32.totalorder %v269_v33, 1 }
  0x16   : > { %v206_v1 = vld.sshfl [vmem:[#allocation1] sm:$0xff pattern:$0x75316420]  ;;  %v207_v2 = vld.sshfl [vmem:[#allocation1 + $0x8] sm:$0xff pattern:$0x75316420] }
  0x17   : > { %210 = vrot.lane.b32.xlu0 %v206_v1, %s520_s22  ;;  %219 = vst [vmem:[#allocation1] ss:$2 sm:$0xff] %v569_v0 }
  0x1e   : > { %v220_v3 = vld.sshfl [vmem:[#allocation1] sm:$0xff pattern:$0x75316420]  ;;  %v221_v4 = vld.sshfl [vmem:[#allocation1 + $0x8] sm:$0xff pattern:$0x75316420] }
  0x1f   : > { %212 = vrot.lane.b32.xlu0 %v207_v2, %s520_s22  ;;  %224 = vrot.lane.b32.xlu1 %v220_v3, %s521_s23  ;;  %241 = vst [vmem:[#allocation1] ss:$2 sm:$0xff] %v569_v0 }
  0x26   : > { %v242_v5 = vld.sshfl [vmem:[#allocation1] sm:$0xff pattern:$0x75316420]  ;;  %v243_v6 = vld.sshfl [vmem:[#allocation1 + $0x8] sm:$0xff pattern:$0x75316420] }
  0x27   : > { %226 = vrot.lane.b32.xlu1 %v221_v4, %s521_s23  ;;  %253 = vst [vmem:[#allocation1] ss:$2 sm:$0xff] %v569_v0  ;;  %246 = vrot.lane.b32.xlu2 %v242_v5, %s522_s24 }
  0x2e   : > { %v255_v8 = vld.sshfl [vmem:[#allocation1 + $0x8] sm:$0xff pattern:$0x75316420]  ;;  %v254_v9 = vld.sshfl [vmem:[#allocation1] sm:$0xff pattern:$0x75316420] }
  0x2f   : > { %260 = vrot.lane.b32.xlu1 %v255_v8, %s523_s25  ;;  %258 = vrot.lane.b32.xlu0 %v254_v9, %s523_s25  ;;  %276 = vst [vmem:[#allocation1] ss:$2 sm:$0xff] %v274_v7 }
  0x30   : > { %248 = vrot.lane.b32.xlu2 %v243_v6, %s522_s24 }
  0x36   : > { %v277_v12 = vld.sshfl [vmem:[#allocation1] sm:$0xff pattern:$0x75316420]  ;;  %v278_v13 = vld.sshfl [vmem:[#allocation1 + $0x8] sm:$0xff pattern:$0x75316420] }
  0x37   : > { %321 = vst [vmem:[#allocation1] ss:$2 sm:$0xff] %v319_v11 }
  0x3e   : > { %v322_v53 = vld.sshfl [vmem:[#allocation1] sm:$0xff pattern:$0x75316420]  ;;  %v323_v54 = vld.sshfl [vmem:[#allocation1 + $0x8] sm:$0xff pattern:$0x75316420] }
  0x3f   : > { %336 = vst [vmem:[#allocation1] ss:$2 sm:$0xff] %v569_v0 }
  0x46   : > { %v337_v26 = vld.sshfl [vmem:[#allocation1] sm:$0xff pattern:$0x75316420]  ;;  %v338_v27 = vld.sshfl [vmem:[#allocation1 + $0x8] sm:$0xff pattern:$0x75316420] }
  0x81   : > { %v247_v21 = vpop.permute.xlu2 %246 }
  0x89   : > { %v211_v15 = vpop.permute.xlu0 %210 }
  0x8a   : > { %v249_v36 = vpop.permute.xlu2 %248 }
  0x8b   : > { %v251_v39 = vsel %vm250_vm6, %v247_v21, %v249_v36  ;;  %v252_v40 = vsel %vm250_vm6, %v249_v36, %v247_v21 }
  0x91   : > { %v225_v17 = vpop.permute.xlu1 %224  ;;  %v213_v28 = vpop.permute.xlu0 %212 }
  0x92   : > { %v217_v34 = vsel %vm216_vm3, %v211_v15, %v213_v28  ;;  %v218_v35 = vsel %vm216_vm3, %v213_v28, %v211_v15 }
  0x99   : > { %v227_v29 = vpop.permute.xlu1 %226 }
  0x9a   : > { %v229_v30 = vsel %vm228_vm2, %v225_v17, %v227_v29  ;;  %v230_v31 = vsel %vm228_vm2, %v227_v29, %v225_v17 }
  0x9b   : > { %v238_v37 = vsel %vm236_vm4, %v229_v30, %v218_v35  ;;  %v239_v38 = vsel %vm237_vm5, %v230_v31, %v217_v34 }
  0x9c   : > { %v281_v43 = vadd.f32 %v277_v12, %v238_v37  ;;  %v282_v44 = vadd.f32 %v278_v13, %v239_v38 }
  0xa1   : > { %v261_v41 = vpop.permute.xlu1 %260  ;;  %v259_v42 = vpop.permute.xlu0 %258 }
  0xa2   : > { %v263_v45 = vsel %vm262_vm7, %v259_v42, %v261_v41  ;;  %v264_v46 = vsel %vm262_vm7, %v261_v41, %v259_v42 }
  0xa3   : > { %v272_v47 = vsel %vm270_vm8, %v264_v46, %v251_v39  ;;  %v273_v48 = vsel %vm271_vm9, %v263_v45, %v252_v40  ;;  %v373_v39 = vld [vmem:[%s627_s2] sm:$0xf]  ;;  %v527_v40 = vmov 839922192  }
  0xa4   : > { %v284_v49 = vadd.f32 %v282_v44, %v273_v48  ;;  %v283_v50 = vadd.f32 %v281_v43, %v272_v47  ;;  %v285_v51 = vsub.f32 %v272_v47, %v238_v37  ;;  %v286_v52 = vsub.f32 %v273_v48, %v239_v38 }
  0xa5   : > { %v368_v41 = vunpack.c.l.s4 %v527_v40 }
  0xa6   : > { %289 = vrot.lane.b32.xlu0 %v284_v49, %s525_s28  ;;  %294 = vrot.lane.b32.xlu1 %v283_v50, %s526_s29  ;;  %v313_v61 = vmul.f32 2.0, %v283_v50  ;;  %v314_v62 = vmul.f32 2.0, %v284_v49  ;;  %v328_v15 = vmul.f32 2.0, %v285_v51  ;;  %v329_v16 = vmul.f32 2.0, %v286_v52 }
  0xa7   : > { %287 = vrot.lane.b32.xlu2 %v283_v50, %s525_s28  ;;  %v369_v42 = vunpack.c.0.s8 %v368_v41 }
  0xae   : > { %301 = vrot.lane.b32.xlu0 %v285_v51, %s525_s28  ;;  %303 = vrot.lane.b32.xlu1 %v286_v52, %s525_s28 }
  0xaf   : > { %296 = vrot.lane.b32.xlu2 %v284_v49, %s526_s29 }
  0xb6   : > { %309 = vrot.lane.b32.xlu0 %v286_v52, %s526_s29  ;;  %365 = vperm.xlu1 %510, %v362_v56  }
  0xb7   : > { %307 = vrot.lane.b32.xlu2 %v285_v51, %s526_s29 }
 0x101   : > { %v288_v55 = vpop.permute.xlu2 %287 }
 0x109   : > { %v297_v2 = vpop.permute.xlu2 %296 }
 0x111   : > { %v308_v17 = vpop.permute.xlu2 %307 }
 0x118   : > { %v290_v57 = vpop.permute.xlu0 %289  ;;  %v295_v58 = vpop.permute.xlu1 %294 }
 0x119   : > { %v292_v59 = vsel %vm291_vm10, %v288_v55, %v290_v57  ;;  %v293_v60 = vsel %vm291_vm10, %v290_v57, %v288_v55  ;;  %v299_v3 = vsel %vm298_vm11, %v295_v58, %v297_v2  ;;  %v300_v4 = vsel %vm298_vm11, %v297_v2, %v295_v58 }
 0x11a   : > { %v315_v63 = vadd.f32 %v313_v61, %v293_v60  ;;  %v316_v1 = vadd.f32 %v314_v62, %v292_v59  ;;  %v334_v13 = vsub.f32 %v299_v3, %v293_v60  ;;  %v335_v14 = vsub.f32 %v300_v4, %v292_v59 }
 0x11c   : > { %v317_v5 = vadd.f32 %v315_v63, %v299_v3  ;;  %v318_v6 = vadd.f32 %v316_v1, %v300_v4  ;;  %v349_v28 = vrot.slane %v334_v13, 4  ;;  %v350_v29 = vrot.slane %v335_v14, 4 }
 0x11e   : > { %v326_v9 = vsub.f32 %v317_v5, %v322_v53  ;;  %v327_v10 = vsub.f32 %v318_v6, %v323_v54 }
 0x120   : > { %v302_v7 = vpop.permute.xlu0 %301  ;;  %v304_v8 = vpop.permute.xlu1 %303  ;;  %v343_v18 = vrot.slane %v326_v9, 4  ;;  %v344_v19 = vrot.slane %v327_v10, 4 }
 0x121   : > { %v305_v11 = vsel %vm291_vm10, %v302_v7, %v304_v8  ;;  %v306_v12 = vsel %vm291_vm10, %v304_v8, %v302_v7 }
 0x122   : > { %v330_v20 = vadd.f32 %v328_v15, %v306_v12  ;;  %v331_v21 = vadd.f32 %v329_v16, %v305_v11  ;;  %v354_v34 = vsel %vm353_vm12, %v337_v26, %v343_v18  ;;  %v355_v35 = vsel %vm353_vm12, %v338_v27, %v344_v19 }
 0x123   : > { %v358_v23 = vand.u32 2147483647, %v354_v34  ;;  %v359_v38 = vand.u32 2147483647, %v355_v35 }
 0x128   : > { %v310_v22 = vpop.permute.xlu0 %309  ;;  %v366_v43 = vpop.permute.xlu1 %365 }
 0x129   : > { %v311_v24 = vsel %vm298_vm11, %v308_v17, %v310_v22  ;;  %v312_v25 = vsel %vm298_vm11, %v310_v22, %v308_v17  ;;  %v370_v44 = vperm.slane %v366_v43, %v369_v42 }
 0x12a   : > { %v332_v30 = vadd.f32 %v330_v20, %v311_v24  ;;  %v333_v31 = vadd.f32 %v331_v21, %v312_v25 }
 0x12b   : > { %v372_v45 = vadd.f32 %v370_v44, %v569_v0 }
 0x12c   : > { %v356_v32 = vsel %vm353_vm12, %v332_v30, %v349_v28  ;;  %v357_v33 = vsel %vm353_vm12, %v333_v31, %v350_v29 }
 0x12d   : > { %v360_v36 = vand.u32 2147483647, %v356_v32  ;;  %v361_v37 = vand.u32 2147483647, %v357_v33 }
 0x12f   : > { %390 = vmatpush.msra.mxu0 %v360_v36  ;;  %410 = vmatpush.msra.mxu1 %v361_v37 }
 0x131   : > { %391 = vmatpush.msra.mxu0 %v358_v23  ;;  %411 = vmatpush.msra.mxu1 %v359_v38 }
 0x133   : > { %392 = vmatpush.msra.mxu0 %v356_v32  ;;  %412 = vmatpush.msra.mxu1 %v357_v33 }
 0x135   : > { %393 = vmatpush.msra.mxu0 %v354_v34  ;;  %413 = vmatpush.msra.mxu1 %v355_v35 }
 0x136   : > { %491 = vmatmul.msk.f32.vlgmr.msra.gmra.mxu1 %vm374_vm13, %v373_v39  ;;  %490 = vmatmul.msk.f32.vlgmr.msra.gmra.mxu0 %vm374_vm13, %v373_v39 }
 0x1b3   : > { %v415_v46 = vpop.f32.mrf.mxu1  ;;  %v395_v47 = vpop.f32.mrf.mxu0 }
 0x1b4   : > { %v420_v48 = vrot.slane %v415_v46, 4 }
 0x1b6   : > { %v421_v49 = vsel %vm353_vm12, %v395_v47, %v420_v48 }
 0x1b7   : > { %v423_v50 = vadd.f32 %v421_v49, %v372_v45 }
 0x1b9   : > { %424 = vst [vmem:[%s199_s10] sm:$0xff] %v423_v50 }
 0x1ba PF: > { %s14_s15 = sadd.s32 1, %s518_s15  }
 0x1bb   : > { %p11_p4 = scmp.ge.s32.totalorder %s14_s15, 4  }
 0x1bd   :  { %13 = sbr.rel (!%p11_p4) target bundleno = 1 (0x1), region = 66 }

</bundles_post_ra>
